<compile_context>
chip_gen: v6e
topology: v6e:2x2x1
jax: 0.10.0
libtpu: 0.0.40
codegen_flags: <defaults>
</compile_context>

<pallas_src>
import jax
import jax.numpy as jnp
from jax.experimental import pallas as pl
from jax.experimental.pallas import tpu as pltpu


def gcn_kernel(x_ref, w1bd_ref, b1_ref, w2_ref, o_ref):
    # x_ref   : (S, B*N)   bf16   -- x transposed/reshaped to (state, batch*node)
    # w1bd_ref: (B*N, B*N) bf16   -- kron(I_B, W1^T), transpose hoisted to wrapper
    # b1_ref  : (1, B*N)   f32    -- conv1 bias tiled across batch
    # w2_ref  : (S, S)     bf16
    # o_ref   : (S, B*N)   f32
    x_bf = x_ref[...]

    # conv1 over the node dim (all batches at once via block-diagonal weight), f32 accumulation.
    h = jnp.dot(x_bf, w1bd_ref[...], preferred_element_type=jnp.float32)   # (S, B*N)

    # bias + residual + ReLU, elementwise in f32 on the VPU.
    h = h + b1_ref[...] + x_bf.astype(jnp.float32)
    h = jnp.maximum(h, 0.0)

    # conv2 over the state dim: (S, S) @ (S, B*N) -> lane-dense (S, B*N) output.
    out = jnp.dot(w2_ref[...], h.astype(jnp.bfloat16),
                  preferred_element_type=jnp.float32)
    o_ref[...] = out.astype(o_ref.dtype)


def gcn_forward(x, w1, b1, w2):
    """x: (B, S, N) f32; w1: (N, N); b1: (N,); w2: (S, S). Returns (B, S, N) f32."""
    B, S, N = x.shape
    BN = B * N

    # Lane-dense slab: (B, S, N) -> (S, B, N) -> (S, B*N); cast matmul operands to bf16.
    x_slab = jnp.transpose(x, (1, 0, 2)).reshape(S, BN).astype(jnp.bfloat16)
    # Hoisted conv1 weight transform: block-diag of W1^T across the batch (computed once).
    w1bd = jnp.kron(jnp.eye(B, dtype=w1.dtype), w1.T).astype(jnp.bfloat16)
    b1_tiled = jnp.tile(b1, B).reshape(1, BN).astype(jnp.float32)
    w2_bf = w2.astype(jnp.bfloat16)

    flops = B * (2 * S * N * N + 2 * S * S * N)
    bytes_accessed = (x_slab.size * 2 + w1bd.size * 2 + b1_tiled.size * 4
                      + w2_bf.size * 2 + S * BN * 4)

    out_slab = pl.pallas_call(
        gcn_kernel,
        out_shape=jax.ShapeDtypeStruct((S, BN), jnp.float32),
        grid_spec=pltpu.PrefetchScalarGridSpec(
            num_scalar_prefetch=0,
            grid=(1,),                                        # single fused invocation
            in_specs=[
                pl.BlockSpec((S, BN), lambda i: (0, 0)),      # x slab (lane dim = 128)
                pl.BlockSpec((BN, BN), lambda i: (0, 0)),     # block-diag W1^T
                pl.BlockSpec((1, BN), lambda i: (0, 0)),      # tiled conv1 bias
                pl.BlockSpec((S, S), lambda i: (0, 0)),       # W2
            ],
            out_specs=pl.BlockSpec((S, BN), lambda i: (0, 0)),
        ),
        compiler_params=pltpu.CompilerParams(
            dimension_semantics=("arbitrary",)),
        cost_estimate=pl.CostEstimate(flops=flops, transcendentals=0,
                                      bytes_accessed=bytes_accessed),
    )(x_slab, w1bd, b1_tiled, w2_bf)

    # (S, B*N) -> (S, B, N) -> back to PyTorch NCL layout (B, S, N).
    return jnp.transpose(out_slab.reshape(S, B, N), (1, 0, 2))


def gcn_reference(x, w1, b1, w2):
    # Pure-JAX f32 reference mirroring the PyTorch forward.
    h = jnp.einsum("bsn,mn->bsm", x, w1) + b1[None, None, :] + x
    h = jnp.maximum(h, 0.0)
    out = jnp.einsum("cs,bsn->bcn", w2, h)
    return out


if __name__ == "__main__":
    B = 2
    num_state = 32   # S  (channels of x)
    num_node = 64    # N  (length of x)

    key = jax.random.PRNGKey(0)
    kx, k1, kb, k2 = jax.random.split(key, 4)

    x = jax.random.normal(kx, (B, num_state, num_node), dtype=jnp.float32)
    # Deterministic synthetic parameters (shapes from nn.Conv1d with kernel_size=1).
    w1 = jax.random.normal(k1, (num_node, num_node), dtype=jnp.float32) * 0.05   # conv1.weight[..., 0]
    b1 = jax.random.normal(kb, (num_node,), dtype=jnp.float32) * 0.05            # conv1.bias
    w2 = jax.random.normal(k2, (num_state, num_state), dtype=jnp.float32) * 0.05 # conv2.weight[..., 0]

    out = jax.block_until_ready(gcn_forward(x, w1, b1, w2))
    ref = gcn_reference(x, w1, b1, w2)

    assert out.shape == (B, num_state, num_node)
    # bf16 matmul operands (f32 accumulation) vs f32 reference -> slightly loosened tolerance.
    assert jnp.allclose(out, ref, atol=2e-2, rtol=2e-2), "mismatch vs reference"

    print("KERNEL_OK")
</pallas_src>

<mosaic_0001>
module attributes {stable_mosaic.version = 11 : i64} {
  func.func @gcn_kernel(%arg0: i32, %arg1: memref<32x128xbf16, #tpu.memory_space<vmem>>, %arg2: memref<128x128xbf16, #tpu.memory_space<vmem>>, %arg3: memref<1x128xf32, #tpu.memory_space<vmem>>, %arg4: memref<32x32xbf16, #tpu.memory_space<vmem>>, %arg5: memref<32x128xf32, #tpu.memory_space<vmem>>) attributes {dimension_semantics = [#tpu.dimension_semantics<arbitrary>], iteration_bounds = array<i64: 1>, scalar_prefetch = 0 : i64, scratch_operands = 0 : i64, tpu.core_type = #tpu.core_type<tc>, window_params = [{pipeline_mode = #tpu.pipeline_mode<synchronous>, transform_indices = @transform_0, window_bounds = array<i64: 32, 128>}, {pipeline_mode = #tpu.pipeline_mode<synchronous>, transform_indices = @transform_1, window_bounds = array<i64: 128, 128>}, {pipeline_mode = #tpu.pipeline_mode<synchronous>, transform_indices = @transform_2, window_bounds = array<i64: 1, 128>}, {pipeline_mode = #tpu.pipeline_mode<synchronous>, transform_indices = @transform_3, window_bounds = array<i64: 32, 32>}, {pipeline_mode = #tpu.pipeline_mode<synchronous>, transform_indices = @transform_4, window_bounds = array<i64: 32, 128>}]} {
    %c0 = arith.constant 0 : index
    %c0_0 = arith.constant 0 : index
    %0 = vector.load %arg1[%c0, %c0_0] : memref<32x128xbf16, #tpu.memory_space<vmem>>, vector<32x128xbf16>
    %c0_1 = arith.constant 0 : index
    %c0_2 = arith.constant 0 : index
    %1 = vector.load %arg2[%c0_1, %c0_2] : memref<128x128xbf16, #tpu.memory_space<vmem>>, vector<128x128xbf16>
    %cst = arith.constant dense<0.000000e+00> : vector<32x128xf32>
    %2 = tpu.matmul %0, %1, %cst {dimension_numbers = #tpu.dot_dimension_numbers<[1], [0], [0], [1], [0, 0, 1, 1], [], []>} : vector<32x128xbf16>, vector<128x128xbf16>, vector<32x128xf32> -> vector<32x128xf32>
    %c0_3 = arith.constant 0 : index
    %c0_4 = arith.constant 0 : index
    %3 = vector.load %arg3[%c0_3, %c0_4] : memref<1x128xf32, #tpu.memory_space<vmem>>, vector<1x128xf32>
    %4 = vector.broadcast %3 : vector<1x128xf32> to vector<32x128xf32>
    %5 = arith.addf %2, %4 : vector<32x128xf32>
    %6 = arith.extf %0 : vector<32x128xbf16> to vector<32x128xf32>
    %7 = arith.addf %5, %6 : vector<32x128xf32>
    %cst_5 = arith.constant 0.000000e+00 : f32
    %8 = vector.broadcast %cst_5 : f32 to vector<32x128xf32>
    %9 = arith.maximumf %7, %8 : vector<32x128xf32>
    %c0_6 = arith.constant 0 : index
    %c0_7 = arith.constant 0 : index
    %10 = vector.load %arg4[%c0_6, %c0_7] : memref<32x32xbf16, #tpu.memory_space<vmem>>, vector<32x32xbf16>
    %11 = arith.truncf %9 : vector<32x128xf32> to vector<32x128xbf16>
    %cst_8 = arith.constant dense<0.000000e+00> : vector<32x128xf32>
    %12 = tpu.matmul %10, %11, %cst_8 {dimension_numbers = #tpu.dot_dimension_numbers<[1], [0], [0], [1], [0, 0, 1, 1], [], []>} : vector<32x32xbf16>, vector<32x128xbf16>, vector<32x128xf32> -> vector<32x128xf32>
    %c0_9 = arith.constant 0 : index
    %c0_10 = arith.constant 0 : index
    %13 = vector.load %arg5[%c0_9, %c0_10] : memref<32x128xf32, #tpu.memory_space<vmem>>, vector<32x128xf32>
    tpu.vector_store %arg5[%c0_9, %c0_10], %12 {strides = array<i32>} : memref<32x128xf32, #tpu.memory_space<vmem>>, vector<32x128xf32>,
    return
  }
  func.func @transform_0(%arg0: i32) -> (i32, i32) {
    %c0_i32 = arith.constant 0 : i32
    %c0_i32_0 = arith.constant 0 : i32
    %c0_i32_1 = arith.constant 0 : i32
    return %c0_i32, %c0_i32_0 : i32, i32
  }
  func.func @transform_1(%arg0: i32) -> (i32, i32) {
    %c0_i32 = arith.constant 0 : i32
    %c0_i32_0 = arith.constant 0 : i32
    %c0_i32_1 = arith.constant 0 : i32
    return %c0_i32, %c0_i32_0 : i32, i32
  }
  func.func @transform_2(%arg0: i32) -> (i32, i32) {
    %c0_i32 = arith.constant 0 : i32
    %c0_i32_0 = arith.constant 0 : i32
    %c0_i32_1 = arith.constant 0 : i32
    return %c0_i32, %c0_i32_0 : i32, i32
  }
  func.func @transform_3(%arg0: i32) -> (i32, i32) {
    %c0_i32 = arith.constant 0 : i32
    %c0_i32_0 = arith.constant 0 : i32
    %c0_i32_1 = arith.constant 0 : i32
    return %c0_i32, %c0_i32_0 : i32, i32
  }
  func.func @transform_4(%arg0: i32) -> (i32, i32) {
    %c0_i32 = arith.constant 0 : i32
    %c0_i32_0 = arith.constant 0 : i32
    %c0_i32_1 = arith.constant 0 : i32
    return %c0_i32, %c0_i32_0 : i32, i32
  }
}

</mosaic_0001>

<bundles_post_ra>
// kernel: tpu_custom_call.1
= control target key start
LH: loop header
LB: loop body
LE: loop exit
PB: predicated region body
PF: predicated region fallthrough
CT: control target
= control target key end

     0   :  { %9 = vsyncpa [#allocation3], 0  ;;  %s517_s0 = inlined_call_operand.hbm [shape: bf16[32,128], index: 0, kind: input, shape index: {}]   ;;  %s518_s1 = inlined_call_operand.hbm [shape: bf16[128,128], index: 1, kind: input, shape index: {}]   ;;  %s519_s2 = inlined_call_operand.vmem [shape: f32[1,128], index: 2, kind: input, shape index: {}]   ;;  %s520_s3 = inlined_call_operand.hbm [shape: bf16[32,32], index: 3, kind: input, shape index: {}]   ;;  %s521_s4 = inlined_call_operand.hbm [shape: f32[32,128], index: 4, kind: output, shape index: {}]  }
   0x1   :  { %10 = vsyncpa [#allocation6], 0 }
   0x2   :  { %11 = vsyncpa [#allocation4], 0  ;;  %s467_s15 = smov [#allocation5]   ;;  %s468_s17 = smov [#allocation2]  }
   0x3   :  { %s29_s16 = sshll.u32 %s467_s15, 4  ;;  %s17_s18 = sshll.u32 %s468_s17, 4  ;;  %s30_s16 = int_to_ptr.vmem [resolvable:$true] %s29_s16  ;;  %s18_s18 = int_to_ptr.vmem [resolvable:$true] %s17_s18 }
   0x4   :  { %s389_s19 = scalar_lea.vmem %s30_s16, 1024  ;;  %p394_p1 = scmp.lt.s32.totalorder %s30_s16, %s30_s16 }
   0x5   :  { %p390_p0 = scmp.ne.s32.totalorder %s30_s16, %s389_s19  ;;  %p395_p2 = scmp.lt.s32.totalorder %s389_s19, %s389_s19 }
   0x7   :  { %p396_p3 = por %p395_p2, %p394_p1 }
   0x9   :  { %p397_p4 = pnand %p396_p3, %p390_p0 }
   0xb   :  { %400 = shalt.err (!%p397_p4)
}
   0xc   :  { %s469_s20 = smov 64   ;;  %s470_s21 = smov 4  }
   0xd   :  { %35 = dma.hbm_to_vmem [thread:$0]  %s518_s1, 1024, %s30_s16, [#allocation6], %s469_s20, %s469_s20, %s470_s21  }
   0xe   :  { %s409_s24 = scalar_lea.vmem %s18_s18, 256  ;;  %p414_p6 = scmp.lt.s32.totalorder %s18_s18, %s18_s18 }
   0xf   :  { %p410_p5 = scmp.ne.s32.totalorder %s18_s18, %s409_s24  ;;  %p415_p7 = scmp.lt.s32.totalorder %s409_s24, %s409_s24 }
  0x11   :  { %p416_p8 = por %p415_p7, %p414_p6 }
  0x13   :  { %p417_p9 = pnand %p416_p8, %p410_p5 }
  0x15   :  { %420 = shalt.err (!%p417_p9)
}
  0x16   :  { %23 = dma.hbm_to_vmem [thread:$0]  %s517_s0, 256, %s18_s18, [#allocation3], %s469_s20, %s469_s20, %s470_s21  }
  0x17   :  { %s471_s27 = smov [#allocation7]  }
  0x18   :  { %s43_s28 = sshll.u32 %s471_s27, 4  ;;  %s44_s28 = int_to_ptr.vmem [resolvable:$true] %s43_s28 }
  0x19   :  { %s429_s29 = scalar_lea.vmem %s44_s28, 256  ;;  %p434_p11 = scmp.lt.s32.totalorder %s44_s28, %s44_s28 }
  0x1a   :  { %p430_p10 = scmp.ne.s32.totalorder %s44_s28, %s429_s29  ;;  %p435_p12 = scmp.lt.s32.totalorder %s429_s29, %s429_s29 }
  0x1c   :  { %p436_p13 = por %p435_p12, %p434_p11 }
  0x1e   :  { %p437_p0 = pnand %p436_p13, %p430_p10 }
  0x20   :  { %440 = shalt.err (!%p437_p0)
}
  0x21   :  { %49 = dma.hbm_to_vmem [thread:$0]  %s520_s3, 256, %s44_s28, [#allocation6], %s469_s20, %s469_s20, %s470_s21  }
  0x22   :  { %461 = dma.done.wait [#allocation3], 256  }
  0x23   :  { %462 = vsyncadd [#allocation3], 4294967040 }
  0x24   :  { %463 = dma.done.wait [#allocation6], 1280  }
  0x25   :  { %464 = vsyncadd [#allocation6], 4294966016  ;;  %v367_v0 = vld [vmem:[#allocation5 + $0x38] sm:$0xff]   ;;  %v368_v1 = vld [vmem:[#allocation5 + $0x30] sm:$0xff]   ;;  %vm224_vm0 = vcmask 261120  }
  0x26   :  { %331 = vmatprep.subr.bf16.mxu0 %v367_v0  ;;  %v369_v2 = vld [vmem:[#allocation5 + $0x28] sm:$0xff]   ;;  %v370_v3 = vld [vmem:[#allocation5 + $0x20] sm:$0xff]   ;;  %v60_v4 = vld [vmem:[#allocation2] sm:$0xff]  }
  0x27   :  { %332 = vmatpush3.bf16.msra.mxu0 %v367_v0  ;;  %347 = vmatprep.mubr.bf16.mxu0 %v60_v4  ;;  %v371_v5 = vld [vmem:[#allocation5 + $0x18] sm:$0xff]   ;;  %v372_v6 = vld [vmem:[#allocation5 + $0x10] sm:$0xff]   ;;  %v373_v7 = vld [vmem:[#allocation5 + $0x8] sm:$0xff]   ;;  %v196_v16 = vunpack.c.l.bf16 %v60_v4  ;;  %v197_v20 = vunpack.c.h.bf16 %v60_v4 }
  0x28   :  { %333 = vmatprep.subr.bf16.mxu0 %v368_v1  ;;  %v374_v8 = vld [vmem:[#allocation5] sm:$0xff]   ;;  %v62_v9 = vld [vmem:[#allocation2 + $0x8] sm:$0xff]   ;;  %v302_v11 = vld [vmem:[%s519_s2] ss:$0 sm:$0xff]  ;;  %s472_s2 = smov [#allocation8]  }
  0x29   :  { %v377_v10 = vld [vmem:[#allocation7] sm:$0xff]   ;;  %v198_v14 = vunpack.c.l.bf16 %v62_v9  ;;  %v199_v18 = vunpack.c.h.bf16 %v62_v9  ;;  %v378_v34 = vld [vmem:[#allocation7 + $0x8] sm:$0xff]   ;;  %s289_s5 = sshll.u32 %s472_s2, 4  ;;  %s290_s5 = int_to_ptr.vmem [resolvable:$true] %s289_s5 }
  0x2a   :  { %355 = vmatprep.mubr.msk.bf16.mxu1 %vm224_vm0, %v377_v10  ;;  %s441_s6 = scalar_lea.vmem %s290_s5, 512  ;;  %p446_p2 = scmp.lt.s32.totalorder %s290_s5, %s290_s5 }
  0x2b   :  { %334 = vmatpush3.bf16.msra.mxu0 %v368_v1  ;;  %p442_p1 = scmp.ne.s32.totalorder %s290_s5, %s441_s6  ;;  %p447_p3 = scmp.lt.s32.totalorder %s441_s6, %s441_s6 }
  0x2c   :  { %335 = vmatprep.subr.bf16.mxu0 %v369_v2 }
  0x2d   :  { %p448_p4 = por %p447_p3, %p446_p2 }
  0x2f   :  { %336 = vmatpush3.bf16.msra.mxu0 %v369_v2  ;;  %p449_p5 = pnand %p448_p4, %p442_p1 }
  0x30   :  { %337 = vmatprep.subr.bf16.mxu0 %v370_v3 }
  0x33   :  { %338 = vmatpush3.bf16.msra.mxu0 %v370_v3 }
  0x34   :  { %339 = vmatprep.subr.bf16.mxu0 %v371_v5 }
  0x37   :  { %340 = vmatpush3.bf16.msra.mxu0 %v371_v5 }
  0x38   :  { %341 = vmatprep.subr.bf16.mxu0 %v372_v6 }
  0x3b   :  { %342 = vmatpush3.bf16.msra.mxu0 %v372_v6 }
  0x3c   :  { %343 = vmatprep.subr.bf16.mxu0 %v373_v7 }
  0x3f   :  { %344 = vmatpush3.bf16.msra.mxu0 %v373_v7 }
  0x40   :  { %345 = vmatprep.subr.bf16.mxu0 %v374_v8 }
  0x43   :  { %346 = vmatpush3.bf16.msra.mxu0 %v374_v8 }
  0x46   :  { %348 = vmatmul.mubr.bf16.vlgmr.msra.gmra.mxu0 %v62_v9 }
 0x106   :  { %v349_v12 = vpop.f32.mrf.mxu0 }
 0x107   :  { %v190_v13 = vadd.f32 %v349_v12, %v302_v11 }
 0x108   :  { %v181_v15 = vpop.f32.mrf.mxu0 }
 0x109   :  { %v182_v17 = vadd.f32 %v302_v11, %v181_v15  ;;  %v202_v21 = vadd.f32 %v198_v14, %v190_v13 }
 0x10a   :  { %v350_v19 = vpop.f32.mrf.mxu0 }
 0x10b   :  { %v193_v22 = vadd.f32 %v350_v19, %v302_v11  ;;  %v200_v24 = vadd.f32 %v196_v16, %v182_v17  ;;  %v206_v27 = vmax.f32 %v202_v21, 0.0 }
 0x10c   :  { %v184_v23 = vpop.f32.mrf.mxu0 }
 0x10d   :  { %v203_v25 = vadd.f32 %v199_v18, %v193_v22  ;;  %v185_v26 = vadd.f32 %v302_v11, %v184_v23  ;;  %v204_v30 = vmax.f32 %v200_v24, 0.0 }
 0x10f   :  { %v207_v28 = vmax.f32 %v203_v25, 0.0  ;;  %v201_v29 = vadd.f32 %v197_v20, %v185_v26 }
 0x111   :  { %v205_v31 = vmax.f32 %v201_v29, 0.0  ;;  %v213_v32 = vpack.c.bf16 %v207_v28, %v206_v27 }
 0x113   :  { %351 = vmatprep.subr.bf16.mxu1 %v213_v32  ;;  %v212_v33 = vpack.c.bf16 %v205_v31, %v204_v30 }
 0x114   :  { %352 = vmatpush3.bf16.msra.mxu1 %v213_v32 }
 0x115   :  { %353 = vmatprep.subr.bf16.mxu1 %v212_v33 }
 0x118   :  { %354 = vmatpush3.bf16.msra.mxu1 %v212_v33 }
 0x11b   :  { %356 = vmatmul.mubr.msk.bf16.vlgmr.msra.gmra.mxu1 %vm224_vm0, %v378_v34 }
 0x1db   :  { %v357_v35 = vpop.f32.mrf.mxu1 }
 0x1dc   :  { %282 = vst [vmem:[#allocation8 + $0x10] sm:$0xff] %v357_v35 }
 0x1dd   :  { %v265_v36 = vpop.f32.mrf.mxu1 }
 0x1de   :  { %280 = vst [vmem:[#allocation8] sm:$0xff] %v265_v36 }
 0x1df   :  { %v358_v37 = vpop.f32.mrf.mxu1 }
 0x1e0   :  { %283 = vst [vmem:[#allocation8 + $0x18] sm:$0xff] %v358_v37 }
 0x1e1   :  { %v268_v38 = vpop.f32.mrf.mxu1 }
 0x1e2   :  { %281 = vst [vmem:[#allocation8 + $0x8] sm:$0xff] %v268_v38 }
 0x1e3   :  { %452 = shalt.err (!%p449_p5)
}
 0x1e4   :  { %s473_s7 = smov 128   ;;  %s474_s8 = smov 8  }
 0x1e5   :  { %295 = dma.vmem_to_hbm [thread:$0]  %s290_s5, 512, %s521_s4, [#allocation4], %s473_s7, %s473_s7, %s474_s8  }
 0x1e6   :  { %465 = dma.done.wait [#allocation4], 512  }
 0x1e7   :  { %466 = vsyncadd [#allocation4], 4294966784 }
 0x1e8   :  { %299 = vsyncpa [#allocation3], 1 }
 0x1e9   :  { %300 = vsyncpa [#allocation6], 1 }
 0x1ea   :  { %301 = vsyncpa [#allocation4], 1 }

</bundles_post_ra>
